<compile_context>
chip_gen: v7x
topology: tpu7x:2x2x1
jax: 0.10.0
libtpu: 0.0.40
codegen_flags: <defaults>
</compile_context>

<pallas_src>
import jax
import jax.numpy as jnp
from jax.experimental import pallas as pl
from jax.experimental.pallas import tpu as pltpu

HIDDEN = 256


def _critic_kernel(x_ref, w1_ref, b1_ref, w2_ref, b2_ref, w3_ref, b3_ref,
                   o_ref):
    # fc1: single K=(state_dim+action_dim) matmul, bf16 operands, f32 acc.
    h1 = (jnp.dot(x_ref[...], w1_ref[...], preferred_element_type=jnp.float32)
          + b1_ref[...])
    h1 = jnp.maximum(h1, 0.0)

    # fc2: bf16 operand into the MXU, f32 accumulate.
    h2 = (jnp.dot(h1.astype(jnp.bfloat16), w2_ref[...],
                  preferred_element_type=jnp.float32)
          + b2_ref[...])
    h2 = jnp.maximum(h2, 0.0)

    # fc3 (out_features == 1): VPU multiply + lane reduction instead of a
    # lane-sparse 1-column MXU matmul.
    w3 = w3_ref[...].astype(jnp.float32)          # (1, HIDDEN) row
    b3 = b3_ref[0, 0]                             # scalar bias from SMEM
    q = jnp.sum(h2 * w3, axis=-1, keepdims=True) + b3
    o_ref[...] = q.astype(o_ref.dtype)


def _round_up(x, m):
    return (x + m - 1) // m * m


@jax.jit
def critic_forward(state, action, params):
    """state: (B, state_dim) f32, action: (B, action_dim) f32 -> (B, 1) f32."""
    w1, b1, w2, b2, w3, b3 = params
    B = state.shape[0]
    K = w1.shape[0]          # state_dim + action_dim
    H = w2.shape[0]

    # Fuse the concat in the wrapper (one K=S+A matmul in the kernel) and
    # cast activations to bf16 here to halve the input DMA bytes.
    x = jnp.concatenate([state, action], axis=1).astype(jnp.bfloat16)

    # Batch tile: multiple of 8 sublanes, capped at 1024 rows.  cdiv(B, 2)
    # guarantees >=2 grid steps whenever B spans more than one tile, so both
    # v7x TensorCores get work under dimension_semantics=("parallel",).
    cap = 1024
    tb = min(_round_up(max(pl.cdiv(B, 2), 1), 8), cap)
    bp = _round_up(B, tb)
    if bp != B:
        x = jnp.pad(x, ((0, bp - B), (0, 0)))

    resident = lambda i: (0, 0)   # weights/biases stay in VMEM across tiles
    out = pl.pallas_call(
        _critic_kernel,
        out_shape=jax.ShapeDtypeStruct((bp, 1), jnp.float32),
        grid_spec=pltpu.PrefetchScalarGridSpec(
            num_scalar_prefetch=0,
            grid=(bp // tb,),
            in_specs=[
                pl.BlockSpec((tb, K), lambda i: (i, 0)),   # x = [s, a] (bf16)
                pl.BlockSpec((K, H), resident),            # W1 (bf16)
                pl.BlockSpec((1, H), resident),            # b1 (f32)
                pl.BlockSpec((H, H), resident),            # W2 (bf16)
                pl.BlockSpec((1, H), resident),            # b2 (f32)
                pl.BlockSpec((1, H), resident),            # W3 row (bf16)
                pl.BlockSpec(memory_space=pltpu.MemorySpace.SMEM),  # b3 (1,1)
            ],
            out_specs=pl.BlockSpec((tb, 1), lambda i: (i, 0)),
        ),
        compiler_params=pltpu.CompilerParams(
            dimension_semantics=("parallel",)),
    )(x, w1, b1, w2, b2, w3, b3)
    return out[:B]


def init_critic_params(key, state_dim, action_dim, hidden=HIDDEN):
    """PyTorch nn.Linear-style init (U[-1/sqrt(fan_in), +]); weights -> bf16."""
    def linear(k, fan_in, fan_out):
        kw, kb = jax.random.split(k)
        bound = 1.0 / jnp.sqrt(fan_in)
        w = jax.random.uniform(kw, (fan_in, fan_out), jnp.float32, -bound, bound)
        b = jax.random.uniform(kb, (1, fan_out), jnp.float32, -bound, bound)
        return w, b

    k1, k2, k3 = jax.random.split(key, 3)
    w1, b1 = linear(k1, state_dim + action_dim, hidden)
    w2, b2 = linear(k2, hidden, hidden)
    w3, b3 = linear(k3, hidden, 1)

    w1 = w1.astype(jnp.bfloat16)              # (S+A, hidden)
    w2 = w2.astype(jnp.bfloat16)              # (hidden, hidden)
    w3_row = w3.T.astype(jnp.bfloat16)        # (1, hidden)
    b3 = b3.reshape(1, 1)                     # scalar bias as (1, 1) f32
    return (w1, b1, w2, b2, w3_row, b3)


def critic_reference(state, action, params):
    """Pure-JAX reference with the same bf16-operand / f32-accumulate math."""
    w1, b1, w2, b2, w3, b3 = params
    f32 = jnp.float32
    x = jnp.concatenate([state, action], axis=1).astype(jnp.bfloat16)
    h1 = jnp.maximum(jnp.dot(x, w1, preferred_element_type=f32) + b1, 0.0)
    h2 = jnp.maximum(
        jnp.dot(h1.astype(jnp.bfloat16), w2, preferred_element_type=f32) + b2,
        0.0)
    return jnp.sum(h2 * w3.astype(f32), axis=-1, keepdims=True) + b3


if __name__ == "__main__":
    B, STATE_DIM, ACTION_DIM = 8, 16, 8

    key = jax.random.PRNGKey(0)
    k_params, k_state, k_action = jax.random.split(key, 3)

    params = init_critic_params(k_params, STATE_DIM, ACTION_DIM)
    state = jax.random.normal(k_state, (B, STATE_DIM), jnp.float32)
    action = jax.random.normal(k_action, (B, ACTION_DIM), jnp.float32)

    q = critic_forward(state, action, params)
    jax.block_until_ready(q)
    assert q.shape == (B, 1), q.shape

    # Kernel vs. same-precision reference (tight tolerance).
    q_ref = critic_reference(state, action, params)
    assert jnp.allclose(q, q_ref, atol=1e-3, rtol=1e-3), "mismatch vs bf16 reference"

    # Semantics check vs. the original f32 Critic math (relaxed for bf16 weights).
    w1f, b1f, w2f, b2f, w3f, b3f = [p.astype(jnp.float32) for p in params]
    xf = jnp.concatenate([state, action], axis=1)
    h = jnp.maximum(xf @ w1f + b1f, 0.0)
    h = jnp.maximum(h @ w2f + b2f, 0.0)
    q_f32 = h @ w3f.T + b3f
    assert jnp.allclose(q, q_f32, atol=5e-2, rtol=5e-2), "mismatch vs f32 reference"

    # TODO(synk): at RL-typical tiny batches, fusing critic + target-critic
    # into one pallas_call (extra weight set < 300 KB VMEM) would amortize the
    # fixed launch/weight-DMA cost; out of scope for a single-module kernel.
    print("KERNEL_OK")
</pallas_src>

<mosaic_0001>
module attributes {stable_mosaic.version = 11 : i64} {
  func.func @_critic_kernel(%arg0: i32, %arg1: memref<8x24xbf16, #tpu.memory_space<vmem>>, %arg2: memref<24x256xbf16, #tpu.memory_space<vmem>>, %arg3: memref<1x256xf32, #tpu.memory_space<vmem>>, %arg4: memref<256x256xbf16, #tpu.memory_space<vmem>>, %arg5: memref<1x256xf32, #tpu.memory_space<vmem>>, %arg6: memref<1x256xbf16, #tpu.memory_space<vmem>>, %arg7: memref<1x1xf32, #tpu.memory_space<smem>>, %arg8: memref<8x1xf32, #tpu.memory_space<vmem>>) attributes {dimension_semantics = [#tpu.dimension_semantics<parallel>], iteration_bounds = array<i64: 1>, scalar_prefetch = 0 : i64, scratch_operands = 0 : i64, tpu.core_type = #tpu.core_type<tc>, window_params = [{transform_indices = @transform_0, window_bounds = array<i64: 8, 24>}, {pipeline_mode = #tpu.pipeline_mode<synchronous>, transform_indices = @transform_1, window_bounds = array<i64: 24, 256>}, {pipeline_mode = #tpu.pipeline_mode<synchronous>, transform_indices = @transform_2, window_bounds = array<i64: 1, 256>}, {pipeline_mode = #tpu.pipeline_mode<synchronous>, transform_indices = @transform_3, window_bounds = array<i64: 256, 256>}, {pipeline_mode = #tpu.pipeline_mode<synchronous>, transform_indices = @transform_4, window_bounds = array<i64: 1, 256>}, {pipeline_mode = #tpu.pipeline_mode<synchronous>, transform_indices = @transform_5, window_bounds = array<i64: 1, 256>}, {transform_indices = @transform_6, window_bounds = array<i64: 1, 1>}, {transform_indices = @transform_7, window_bounds = array<i64: 8, 1>}]} {
    %c0 = arith.constant 0 : index
    %c0_0 = arith.constant 0 : index
    %0 = vector.load %arg1[%c0, %c0_0] : memref<8x24xbf16, #tpu.memory_space<vmem>>, vector<8x24xbf16>
    %c0_1 = arith.constant 0 : index
    %c0_2 = arith.constant 0 : index
    %1 = vector.load %arg2[%c0_1, %c0_2] : memref<24x256xbf16, #tpu.memory_space<vmem>>, vector<24x256xbf16>
    %cst = arith.constant dense<0.000000e+00> : vector<8x256xf32>
    %2 = tpu.matmul %0, %1, %cst {dimension_numbers = #tpu.dot_dimension_numbers<[1], [0], [0], [1], [0, 0, 1, 1], [], []>} : vector<8x24xbf16>, vector<24x256xbf16>, vector<8x256xf32> -> vector<8x256xf32>
    %c0_3 = arith.constant 0 : index
    %c0_4 = arith.constant 0 : index
    %3 = vector.load %arg3[%c0_3, %c0_4] : memref<1x256xf32, #tpu.memory_space<vmem>>, vector<1x256xf32>
    %4 = vector.broadcast %3 : vector<1x256xf32> to vector<8x256xf32>
    %5 = arith.addf %2, %4 : vector<8x256xf32>
    %cst_5 = arith.constant 0.000000e+00 : f32
    %6 = vector.broadcast %cst_5 : f32 to vector<8x256xf32>
    %7 = arith.maximumf %5, %6 : vector<8x256xf32>
    %8 = arith.truncf %7 : vector<8x256xf32> to vector<8x256xbf16>
    %c0_6 = arith.constant 0 : index
    %c0_7 = arith.constant 0 : index
    %9 = vector.load %arg4[%c0_6, %c0_7] : memref<256x256xbf16, #tpu.memory_space<vmem>>, vector<256x256xbf16>
    %cst_8 = arith.constant dense<0.000000e+00> : vector<8x256xf32>
    %10 = tpu.matmul %8, %9, %cst_8 {dimension_numbers = #tpu.dot_dimension_numbers<[1], [0], [0], [1], [0, 0, 1, 1], [], []>} : vector<8x256xbf16>, vector<256x256xbf16>, vector<8x256xf32> -> vector<8x256xf32>
    %c0_9 = arith.constant 0 : index
    %c0_10 = arith.constant 0 : index
    %11 = vector.load %arg5[%c0_9, %c0_10] : memref<1x256xf32, #tpu.memory_space<vmem>>, vector<1x256xf32>
    %12 = vector.broadcast %11 : vector<1x256xf32> to vector<8x256xf32>
    %13 = arith.addf %10, %12 : vector<8x256xf32>
    %cst_11 = arith.constant 0.000000e+00 : f32
    %14 = vector.broadcast %cst_11 : f32 to vector<8x256xf32>
    %15 = arith.maximumf %13, %14 : vector<8x256xf32>
    %c0_12 = arith.constant 0 : index
    %c0_13 = arith.constant 0 : index
    %16 = vector.load %arg6[%c0_12, %c0_13] : memref<1x256xbf16, #tpu.memory_space<vmem>>, vector<1x256xbf16>
    %17 = arith.extf %16 : vector<1x256xbf16> to vector<1x256xf32>
    %c0_14 = arith.constant 0 : index
    %c0_15 = arith.constant 0 : index
    %18 = memref.load %arg7[%c0_14, %c0_15] : memref<1x1xf32, #tpu.memory_space<smem>>
    %19 = vector.broadcast %17 : vector<1x256xf32> to vector<8x256xf32>
    %20 = arith.mulf %15, %19 : vector<8x256xf32>
    %cst_16 = arith.constant dense<0.000000e+00> : vector<8xf32>
    %21 = vector.multi_reduction <add>, %20, %cst_16 [1] : vector<8x256xf32> to vector<8xf32>
    %22 = vector.shape_cast %21 : vector<8xf32> to vector<8x1xf32>
    %23 = vector.broadcast %18 : f32 to vector<8x1xf32>
    %24 = arith.addf %22, %23 : vector<8x1xf32>
    %c0_17 = arith.constant 0 : index
    %c0_18 = arith.constant 0 : index
    %25 = vector.load %arg8[%c0_17, %c0_18] : memref<8x1xf32, #tpu.memory_space<vmem>>, vector<8x1xf32>
    tpu.vector_store %arg8[%c0_17, %c0_18], %24 {strides = array<i32>} : memref<8x1xf32, #tpu.memory_space<vmem>>, vector<8x1xf32>,
    return
  }
  func.func @transform_0(%arg0: i32) -> (i32, i32) {
    %c0_i32 = arith.constant 0 : i32
    %c0_i32_0 = arith.constant 0 : i32
    return %arg0, %c0_i32 : i32, i32
  }
  func.func @transform_1(%arg0: i32) -> (i32, i32) {
    %c0_i32 = arith.constant 0 : i32
    %c0_i32_0 = arith.constant 0 : i32
    %c0_i32_1 = arith.constant 0 : i32
    return %c0_i32, %c0_i32_0 : i32, i32
  }
  func.func @transform_2(%arg0: i32) -> (i32, i32) {
    %c0_i32 = arith.constant 0 : i32
    %c0_i32_0 = arith.constant 0 : i32
    %c0_i32_1 = arith.constant 0 : i32
    return %c0_i32, %c0_i32_0 : i32, i32
  }
  func.func @transform_3(%arg0: i32) -> (i32, i32) {
    %c0_i32 = arith.constant 0 : i32
    %c0_i32_0 = arith.constant 0 : i32
    %c0_i32_1 = arith.constant 0 : i32
    return %c0_i32, %c0_i32_0 : i32, i32
  }
  func.func @transform_4(%arg0: i32) -> (i32, i32) {
    %c0_i32 = arith.constant 0 : i32
    %c0_i32_0 = arith.constant 0 : i32
    %c0_i32_1 = arith.constant 0 : i32
    return %c0_i32, %c0_i32_0 : i32, i32
  }
  func.func @transform_5(%arg0: i32) -> (i32, i32) {
    %c0_i32 = arith.constant 0 : i32
    %c0_i32_0 = arith.constant 0 : i32
    %c0_i32_1 = arith.constant 0 : i32
    return %c0_i32, %c0_i32_0 : i32, i32
  }
  func.func @transform_6(%arg0: i32) -> (i32, i32) {
    %c0_i32 = arith.constant 0 : i32
    %c0_i32_0 = arith.constant 0 : i32
    %c0_i32_1 = arith.constant 0 : i32
    return %c0_i32, %c0_i32_0 : i32, i32
  }
  func.func @transform_7(%arg0: i32) -> (i32, i32) {
    %c0_i32 = arith.constant 0 : i32
    %c0_i32_0 = arith.constant 0 : i32
    return %arg0, %c0_i32 : i32, i32
  }
}

</mosaic_0001>

<bundles_post_ra>
// kernel: critic_forward.1
= control target key start
LH: loop header
LB: loop body
LE: loop exit
PB: predicated region body
PF: predicated region fallthrough
CT: control target
= control target key end

     0   :  { %13 = vsyncpa [#allocation4], 0  ;;  %s531_s24 = smov [#allocation3]   ;;  %s614_s0 = inlined_call_operand.vmem [shape: bf16[8,24], index: 0, kind: input, shape index: {}]   ;;  %s615_s1 = inlined_call_operand.vmem [shape: bf16[24,256], index: 1, kind: input, shape index: {}]   ;;  %s616_s2 = inlined_call_operand.vmem [shape: f32[1,256], index: 2, kind: input, shape index: {}]   ;;  %s617_s3 = inlined_call_operand.hbm [shape: bf16[256,256], index: 3, kind: input, shape index: {}]   ;;  %s618_s4 = inlined_call_operand.vmem [shape: f32[1,256], index: 4, kind: input, shape index: {}]   ;;  %s619_s5 = inlined_call_operand.vmem [shape: bf16[1,256], index: 5, kind: input, shape index: {}]   ;;  %s620_s6 = inlined_call_operand.<no memory space> [shape: f32[1,1], index: 6, kind: input, shape index: {}]   ;;  %s621_s7 = inlined_call_operand.vmem [shape: f32[8,1], index: 7, kind: output, shape index: {}]  }
   0x1   :  { %s25_s25 = sshll.u32 %s531_s24, 4  ;;  %s507_s28 = scalar_lea.hbm %s617_s3, 4096  ;;  %s26_s25 = int_to_ptr.vmem [resolvable:$true] %s25_s25 }
   0x2   :  { %p508_p0 = scmp.ne.s32.totalorder %s617_s3, %s507_s28  ;;  %p511_p1 = scmp.lt.u32.totalorder %s507_s28, %s617_s3 }
   0x4   :  { %p513_p2 = pnand %p511_p1, %p508_p0 }
   0x6   :  { %516 = shalt.err (!%p513_p2)
}
   0x7   :  { %s517_s10 = scalar_lea.vmem %s26_s25, 4096  ;;  %p522_p4 = scmp.lt.s32.totalorder %s26_s25, %s26_s25 }
   0x8   :  { %p518_p3 = scmp.ne.s32.totalorder %s26_s25, %s517_s10  ;;  %p523_p5 = scmp.lt.s32.totalorder %s517_s10, %s517_s10 }
   0xa   :  { %p524_p6 = por %p523_p5, %p522_p4 }
   0xc   :  { %p525_p7 = pnand %p524_p6, %p518_p3 }
   0xe   :  { %528 = shalt.err (!%p525_p7)
}
   0xf   :  { %s532_s11 = smov 128   ;;  %s533_s12 = smov 8  }
  0x10   :  { %31 = dma.hbm_to_vmem [thread:$0]  %s617_s3, 4096, %s26_s25, [#allocation4], %s532_s11, %s532_s11, %s533_s12  }
  0x11   :  { %529 = dma.done.wait [#allocation4], 4096  }
  0x12   :  { %530 = vsyncadd [#allocation4], 4294963200  ;;  %v534_v0 = vmov 0   ;;  %v454_v1 = vld [vmem:[%s615_s1 + $0x4] ss:$8 sps:$4 sm:$0xff]   ;;  %v45_v3 = vld [vmem:[%s615_s1 + $0x10] sm:$0xff]  ;;  %v48_v40 = vlaneseq }
  0x13   :  { %116 = vmatprep.mubr.bf16.mxu0 %v534_v0  ;;  %v456_v2 = vld [vmem:[%s615_s1] ss:$8 sps:$4 sm:$0xff]   ;;  %vm77_vm0 = vcmask 1043456   ;;  %84 = vmatprep.subr.bf16.mxu0 %v454_v1  ;;  %v415_v4 = vcombine.high %v45_v3, %v45_v3  ;;  %v414_v5 = vcombine.low %v45_v3, %v45_v3  ;;  %v459_v6 = vld [vmem:[#allocation3 + $0x4] ss:$8 sps:$4 sm:$0xff]   ;;  %vm73_vm1 = vcmask 195584  }
  0x14   :  { %85 = vmatpush1.bf16.msra.mxu0 %v456_v2  ;;  %v461_v7 = vld [vmem:[#allocation3] ss:$8 sps:$4 sm:$0xff]   ;;  %333 = vmatprep.subr.bf16.mxu1 %v459_v6  ;;  %v462_v9 = vld [vmem:[#allocation3 + $0x14] ss:$8 sps:$4 sm:$0xff]   ;;  %v464_v10 = vld [vmem:[#allocation3 + $0x10] ss:$8 sps:$4 sm:$0xff]  }
  0x15   :  { %416 = vmatprep.subr.msk.bf16.mxu0 %vm77_vm0, %v415_v4  ;;  %v79_v8 = vsel %vm77_vm0, %v414_v5, 0  ;;  %334 = vmatpush1.bf16.msra.mxu1 %v461_v7  ;;  %v465_v11 = vld [vmem:[#allocation3 + $0x24] ss:$8 sps:$4 sm:$0xff]   ;;  %v42_v12 = vld [vmem:[%s614_s0] sm:$0xf]  ;;  %v49_v41 = vshrl.u32 %v48_v40, 7 }
  0x16   :  { %335 = vmatprep.subr.bf16.mxu1 %v462_v9  ;;  %v467_v13 = vld [vmem:[#allocation3 + $0x20] ss:$8 sps:$4 sm:$0xff]   ;;  %v468_v14 = vld [vmem:[#allocation3 + $0x34] ss:$8 sps:$4 sm:$0xff]   ;;  %v470_v15 = vld [vmem:[#allocation3 + $0x30] ss:$8 sps:$4 sm:$0xff]  }
  0x17   :  { %v471_v16 = vld [vmem:[#allocation3 + $0x44] ss:$8 sps:$4 sm:$0xff]   ;;  %v473_v17 = vld [vmem:[#allocation3 + $0x40] ss:$8 sps:$4 sm:$0xff]   ;;  %v474_v18 = vld [vmem:[#allocation3 + $0x54] ss:$8 sps:$4 sm:$0xff]  }
  0x18   :  { %87 = vmatpush1.bf16.msra.mxu0 %v79_v8  ;;  %v476_v19 = vld [vmem:[#allocation3 + $0x50] ss:$8 sps:$4 sm:$0xff]   ;;  %v477_v20 = vld [vmem:[#allocation3 + $0x64] ss:$8 sps:$4 sm:$0xff]   ;;  %v479_v21 = vld [vmem:[#allocation3 + $0x60] ss:$8 sps:$4 sm:$0xff]  }
  0x19   :  { %336 = vmatpush1.bf16.msra.mxu1 %v464_v10  ;;  %v480_v22 = vld [vmem:[#allocation3 + $0x74] ss:$8 sps:$4 sm:$0xff]   ;;  %v482_v23 = vld [vmem:[#allocation3 + $0x70] ss:$8 sps:$4 sm:$0xff]   ;;  %v483_v24 = vld [vmem:[#allocation3 + $0x84] ss:$8 sps:$4 sm:$0xff]  }
  0x1a   :  { %337 = vmatprep.subr.bf16.mxu1 %v465_v11  ;;  %v485_v25 = vld [vmem:[#allocation3 + $0x80] ss:$8 sps:$4 sm:$0xff]   ;;  %v486_v26 = vld [vmem:[#allocation3 + $0x94] ss:$8 sps:$4 sm:$0xff]   ;;  %v488_v27 = vld [vmem:[#allocation3 + $0x90] ss:$8 sps:$4 sm:$0xff]  }
  0x1b   :  { %417 = vmatmul.mubr.msk.bf16.vlgmr.msra.gmra.mrb[0].mxu0 %vm73_vm1, %v42_v12  ;;  %v489_v28 = vld [vmem:[#allocation3 + $0xa4] ss:$8 sps:$4 sm:$0xff]   ;;  %v491_v29 = vld [vmem:[#allocation3 + $0xa0] ss:$8 sps:$4 sm:$0xff]   ;;  %v492_v30 = vld [vmem:[#allocation3 + $0xb4] ss:$8 sps:$4 sm:$0xff]  }
  0x1c   :  { %v494_v31 = vld [vmem:[#allocation3 + $0xb0] ss:$8 sps:$4 sm:$0xff]   ;;  %v495_v32 = vld [vmem:[#allocation3 + $0xc4] ss:$8 sps:$4 sm:$0xff]   ;;  %v497_v33 = vld [vmem:[#allocation3 + $0xc0] ss:$8 sps:$4 sm:$0xff]  }
  0x1d   :  { %338 = vmatpush1.bf16.msra.mxu1 %v467_v13  ;;  %v498_v34 = vld [vmem:[#allocation3 + $0xd4] ss:$8 sps:$4 sm:$0xff]   ;;  %v500_v35 = vld [vmem:[#allocation3 + $0xd0] ss:$8 sps:$4 sm:$0xff]   ;;  %v501_v36 = vld [vmem:[#allocation3 + $0xe4] ss:$8 sps:$4 sm:$0xff]  }
  0x1e   :  { %339 = vmatprep.subr.bf16.mxu1 %v468_v14  ;;  %v503_v37 = vld [vmem:[#allocation3 + $0xe0] ss:$8 sps:$4 sm:$0xff]   ;;  %v504_v38 = vld [vmem:[#allocation3 + $0xf4] ss:$8 sps:$4 sm:$0xff]   ;;  %v506_v39 = vld [vmem:[#allocation3 + $0xf0] ss:$8 sps:$4 sm:$0xff]   ;;  %v403_v14 = vstv %s620_s6 }
  0x1f   :  { %v50_v42 = vsub.s32 0, %v49_v41  ;;  %v46_v43 = vld [vmem:[%s616_s2] sm:$0x3]  ;;  %v54_v44 = vsub.s32 1, %v49_v41  ;;  %v386_v60 = vsub.s32 2, %v49_v41  ;;  %vm405_vm2 = vcmask 7168  }
  0x20   :  { %v376_v57 = vld [vmem:[%s619_s5] sm:$0x3] }
  0x21   :  { %340 = vmatpush1.bf16.msra.mxu1 %v470_v15  ;;  %v51_v45 = vrot.slane %v46_v43, %v50_v42  ;;  %v55_v46 = vrot.slane %v46_v43, %v54_v44  ;;  %v377_v58 = vunpack.c.l.bf16 %v376_v57  ;;  %v161_v59 = vld [vmem:[%s618_s4] sm:$0x3] }
  0x22   :  { %341 = vmatprep.subr.bf16.mxu1 %v471_v16  ;;  %v166_v61 = vrot.slane %v161_v59, %v50_v42  ;;  %v170_v63 = vrot.slane %v161_v59, %v54_v44 }
  0x23   :  { %v383_v62 = vrot.slane %v377_v58, %v50_v42  ;;  %v387_v0 = vrot.slane %v377_v58, %v386_v60 }
  0x25   :  { %342 = vmatpush1.bf16.msra.mxu1 %v473_v17  ;;  %v393_v4 = vrot.slane %v383_v62, %v50_v42  ;;  %v397_v7 = vrot.slane %v387_v0, %v50_v42 }
  0x26   :  { %343 = vmatprep.subr.bf16.mxu1 %v474_v18 }
  0x29   :  { %344 = vmatpush1.bf16.msra.mxu1 %v476_v19 }
  0x2a   :  { %345 = vmatprep.subr.bf16.mxu1 %v477_v20 }
  0x2d   :  { %346 = vmatpush1.bf16.msra.mxu1 %v479_v21 }
  0x2e   :  { %347 = vmatprep.subr.bf16.mxu1 %v480_v22 }
  0x31   :  { %348 = vmatpush1.bf16.msra.mxu1 %v482_v23 }
  0x32   :  { %349 = vmatprep.subr.bf16.mxu1 %v483_v24 }
  0x35   :  { %350 = vmatpush1.bf16.msra.mxu1 %v485_v25 }
  0x36   :  { %351 = vmatprep.subr.bf16.mxu1 %v486_v26 }
  0x39   :  { %352 = vmatpush1.bf16.msra.mxu1 %v488_v27 }
  0x3a   :  { %353 = vmatprep.subr.bf16.mxu1 %v489_v28 }
  0x3d   :  { %354 = vmatpush1.bf16.msra.mxu1 %v491_v29 }
  0x3e   :  { %355 = vmatprep.subr.bf16.mxu1 %v492_v30 }
  0x41   :  { %356 = vmatpush1.bf16.msra.mxu1 %v494_v31 }
  0x42   :  { %357 = vmatprep.subr.bf16.mxu1 %v495_v32 }
  0x45   :  { %358 = vmatpush1.bf16.msra.mxu1 %v497_v33 }
  0x46   :  { %359 = vmatprep.subr.bf16.mxu1 %v498_v34 }
  0x49   :  { %360 = vmatpush1.bf16.msra.mxu1 %v500_v35 }
  0x4a   :  { %361 = vmatprep.subr.bf16.mxu1 %v501_v36 }
  0x4d   :  { %362 = vmatpush1.bf16.msra.mxu1 %v503_v37 }
  0x4e   :  { %363 = vmatprep.subr.bf16.mxu1 %v504_v38 }
  0x51   :  { %364 = vmatpush1.bf16.msra.mxu1 %v506_v39 }
  0xee   :  { %v118_v47 = vpop.f32.mrb[0].mxu0 }
  0xef   :  { %v119_v48 = vadd.f32 %v118_v47, %v51_v45  ;;  %v120_v49 = vpop.f32.mrb[1].mxu0 }
  0xf0   :  { %v121_v50 = vadd.f32 %v120_v49, %v55_v46  ;;  %v122_v51 = vpop.f32.mrb[2].mxu0 }
  0xf1   :  { %v125_v52 = vmax.f32 %v119_v48, 0.0  ;;  %v123_v53 = vpop.f32.mrb[3].mxu0 }
  0xf2   :  { %v126_v54 = vmax.f32 %v121_v50, 0.0 }
  0xf3   :  { %v127_v56 = vpack.c.bf16 %v125_v52, %v125_v52 }
  0xf4   :  { %v128_v55 = vpack.c.bf16 %v126_v54, %v126_v54 }
  0xf6   :  { %365 = vmatprep.mubr.bf16.mxu1 %v128_v55 }
  0xf7   :  { %366 = vmatmul.mubr.bf16.vlgmr.msra.gmra.mrb[0].mxu1 %v127_v56 }
 0x1ca   :  { %v367_v1 = vpop.f32.mrb[0].mxu1 }
 0x1cb   :  { %v368_v2 = vadd.f32 %v367_v1, %v166_v61  ;;  %v369_v3 = vpop.f32.mrb[1].mxu1 }
 0x1cc   :  { %v370_v5 = vadd.f32 %v369_v3, %v170_v63  ;;  %v371_v6 = vpop.f32.mrb[2].mxu1 }
 0x1cd   :  { %v374_v8 = vmax.f32 %v368_v2, 0.0  ;;  %v372_v9 = vpop.f32.mrb[3].mxu1 }
 0x1ce   :  { %v375_v10 = vmax.f32 %v370_v5, 0.0 }
 0x1cf   :  { %v398_v11 = vmul.f32 %v393_v4, %v374_v8 }
 0x1d0   :  { %v399_v12 = vmul.f32 %v397_v7, %v375_v10 }
 0x1d2   :  { %v400_v13 = vadd.f32 %v399_v12, %v398_v11 }
 0x1d4   :  { %401 = vadd.xlane.f32.xlu0 %v400_v13 }
 0x261   :  { %v402_v15 = vpop.xlane.xlu0 %401 }
 0x262   :  { %v404_v16 = vadd.f32 %v403_v14, %v402_v15 }
 0x264   :  { %406 = vst.msk [vmem:[%s621_s7] sm:$0xff] %vm405_vm2, %v404_v16 }
 0x265   :  { %411 = vsyncpa [#allocation4], 1 }

</bundles_post_ra>
